<compile_context>
chip_gen: v6e
topology: v6e:2x2x1
jax: 0.10.0
libtpu: 0.0.40
codegen_flags: <defaults>
</compile_context>

<pallas_src>
import functools

import jax
import jax.numpy as jnp
from jax.experimental import pallas as pl
from jax.experimental.pallas import tpu as pltpu

PATCH = 3            # patch_size fixed at the module default
_LANE = 128
_SUBLANE = 8
_LIVE_F32_SLABS = 10  # conservative count of simultaneously-live f32 slabs


def _round_up(x, m):
    return (x + m - 1) // m * m


def _cdiv(a, b):
    return -(-a // b)


def _vmem_config():
    # Tight budget on 64 MiB-VMEM chips (v7x), roomy on 128 MiB chips (v5e/v6e).
    try:
        cap = pltpu.get_tpu_info().vmem_capacity_bytes
    except Exception:
        cap = 64 * 1024 * 1024
    if cap >= 96 * 1024 * 1024:
        return 40 * 1024 * 1024, 64 * 1024 * 1024   # (budget, vmem_limit)
    return 16 * 1024 * 1024, 32 * 1024 * 1024


def _wavg_kernel(xp_ref, o_ref, *, inv_alpha, mask_border):
    # xp_ref: (BR, Wp) slab of stacked strips; every strip carries its own
    # 1-row top/bottom halo, pad rows/cols are exactly zero.
    x = xp_ref[...].astype(jnp.float32)
    rows, wp = x.shape

    m = jnp.min(x)                            # <= 0 (pad rows/cols are zero)
    e = jnp.exp((m - x) * inv_alpha)          # single exp per element, <= 1
    ex = e * x
    e_pad = jnp.exp(m * inv_alpha)            # E of a zero-padded neighbour

    if mask_border:
        lane = jax.lax.broadcasted_iota(jnp.int32, (rows, wp), 1)
        is_first = lane == 0
        is_last = lane == wp - 1

    def colsum3(a, pad_val):
        left = pltpu.roll(a, 1, axis=1)        # value of column j-1
        right = pltpu.roll(a, wp - 1, axis=1)  # value of column j+1
        if mask_border:                        # no spare zero column: mask wrap
            left = jnp.where(is_first, pad_val, left)
            right = jnp.where(is_last, pad_val, right)
        return a + left + right

    def rowsum3(a):
        up = pltpu.roll(a, 1, axis=0)          # value of row r-1
        down = pltpu.roll(a, rows - 1, axis=0)  # value of row r+1
        return a + up + down

    denom = rowsum3(colsum3(e, e_pad))
    num = rowsum3(colsum3(ex, 0.0))

    r = pl.reciprocal(denom, approx=True)
    r = r * (2.0 - denom * r)                  # one Newton step for 1e-4 tol
    o_ref[...] = (num * r).astype(o_ref.dtype)


def weighted_average(x_l, patch_size=3, alpha=1.0, scale_factor=1,
                     _max_rows=None):
    assert patch_size == PATCH, "kernel specialized to the default patch_size=3"
    assert scale_factor == 1, "only scale_factor=1 (identity interpolate) supported"
    N, C, H, W = x_l.shape
    assert C == 1, "WeightedAverage broadcasting requires a single channel"
    dtype = x_l.dtype

    # Lane-dense, 128-aligned width; no extra pad column when W % 128 == 0.
    Wp = max(_LANE, _round_up(W, _LANE))
    mask_border = (Wp == W)

    budget, vmem_limit = _vmem_config()
    itemsize = x_l.dtype.itemsize
    bytes_per_row = (_LIVE_F32_SLABS * 4 + 4 * itemsize) * Wp   # temps + in/out bufs
    max_rows = max(_SUBLANE, budget // bytes_per_row)
    if _max_rows is not None:                 # test hook: force row-strip splitting
        max_rows = max(_SUBLANE, _max_rows)

    # Strip height: tH data rows + 2 halo rows, with tH + 2 a multiple of 8.
    tH = min(H, max(6, max_rows - 2))
    S = _cdiv(H, tH)
    tH = _cdiv(H, S)
    tH = _round_up(tH + 2, _SUBLANE) - 2
    S = _cdiv(H, tH)
    Hsp = tH + 2
    Hpad = S * tH

    # One padded copy in the ORIGINAL dtype (bf16 stays bf16 through HBM):
    # 1 zero halo row on top, zero rows/cols bottom/right.
    x2 = x_l[:, 0]
    xr = jnp.pad(x2, ((0, 0), (1, Hpad - H + 1), (0, Wp - W)))   # (N, Hpad+2, Wp)
    if S == 1:
        slab = xr                                                # (N, Hsp, Wp)
    else:
        # TODO(synk): large-image path still materializes overlapping strips on
        # the host; an Element-offset in_spec / manual DMA would avoid this.
        slab = jnp.stack(
            [xr[:, s * tH: s * tH + Hsp, :] for s in range(S)], axis=1)
    T = N * S
    xp2d = slab.reshape(T * Hsp, Wp)

    # Strips per grid step: fill the VMEM budget; keep >= 2 grid steps when
    # possible so 2-TensorCore chips can shard the "parallel" axis.  No exact
    # divisibility requirement: ragged tail is padded with zero strips.
    nb = max(1, min(T, max_rows // Hsp))
    steps = _cdiv(T, nb)
    if steps == 1 and T >= 2:
        nb = _cdiv(T, 2)
        steps = _cdiv(T, nb)
    T_pad = steps * nb
    if T_pad != T:
        xp2d = jnp.pad(xp2d, ((0, (T_pad - T) * Hsp), (0, 0)))
    BR = nb * Hsp

    kernel = functools.partial(_wavg_kernel, inv_alpha=1.0 / float(alpha),
                               mask_border=mask_border)
    out2d = pl.pallas_call(
        kernel,
        out_shape=jax.ShapeDtypeStruct((T_pad * Hsp, Wp), dtype),
        grid=(steps,),
        in_specs=[pl.BlockSpec((BR, Wp), lambda i: (i, 0))],
        out_specs=pl.BlockSpec((BR, Wp), lambda i: (i, 0)),
        compiler_params=pltpu.CompilerParams(
            dimension_semantics=("parallel",),
            vmem_limit_bytes=vmem_limit),
    )(xp2d)

    # Crop halo/pad rows and pad columns -> (N, 1, H, W); already in orig dtype.
    out = out2d[: T * Hsp].reshape(N, S, Hsp, Wp)[:, :, 1:tH + 1, :W]
    out = out.reshape(N, 1, Hpad, W)[:, :, :H, :]
    return out


def _reference(x_l, patch_size=3, alpha=1.0):
    # Pure-JAX mirror of the PyTorch forward (for verification).
    N, C, H, W = x_l.shape
    pad = patch_size // 2
    xf = x_l.astype(jnp.float32)
    xp = jnp.pad(xf, ((0, 0), (0, 0), (pad, pad), (pad, pad)))
    local_l = jnp.stack(
        [xp[:, 0, di:di + H, dj:dj + W]
         for di in range(patch_size) for dj in range(patch_size)],
        axis=1,
    )                                              # (N, 9, H, W)
    diff = local_l - xf ** 2
    corr = jax.nn.softmax(-diff / alpha, axis=1)
    return jnp.sum(corr * local_l, axis=1, keepdims=True)


if __name__ == "__main__":
    key = jax.random.PRNGKey(0)

    # Case 1: small image, whole images packed, >= 2 parallel grid steps.
    x1 = jax.random.normal(key, (2, 1, 16, 16), dtype=jnp.float32)
    o1 = jax.block_until_ready(weighted_average(x1, patch_size=3, alpha=1.0))
    r1 = _reference(x1)
    assert o1.shape == (2, 1, 16, 16)
    assert jnp.allclose(o1, r1, atol=1e-4, rtol=1e-4), "mismatch vs reference (case 1)"

    # Case 2: force the row-strip (spatial tiling) path on a small shape.
    x2 = jax.random.normal(jax.random.PRNGKey(1), (2, 1, 40, 16), jnp.float32)
    o2 = jax.block_until_ready(weighted_average(x2, _max_rows=16))
    r2 = _reference(x2)
    assert o2.shape == (2, 1, 40, 16)
    assert jnp.allclose(o2, r2, atol=1e-4, rtol=1e-4), "mismatch vs reference (case 2)"

    # Case 3: W is a multiple of 128 -> masked-border (no extra lane pad) path.
    x3 = jax.random.normal(jax.random.PRNGKey(2), (1, 1, 8, 128), jnp.float32)
    o3 = jax.block_until_ready(weighted_average(x3))
    r3 = _reference(x3)
    assert o3.shape == (1, 1, 8, 128)
    assert jnp.allclose(o3, r3, atol=1e-4, rtol=1e-4), "mismatch vs reference (case 3)"

    print("KERNEL_OK")
</pallas_src>

<mosaic_0001>
module attributes {stable_mosaic.version = 11 : i64} {
  func.func @_wavg_kernel(%arg0: i32, %arg1: memref<24x128xf32, #tpu.memory_space<vmem>>, %arg2: memref<24x128xf32, #tpu.memory_space<vmem>>) attributes {dimension_semantics = [#tpu.dimension_semantics<parallel>], iteration_bounds = array<i64: 2>, scalar_prefetch = 0 : i64, scratch_operands = 0 : i64, tpu.core_type = #tpu.core_type<tc>, window_params = [{transform_indices = @transform_0, window_bounds = array<i64: 24, 128>}, {transform_indices = @transform_1, window_bounds = array<i64: 24, 128>}]} {
    %c0 = arith.constant 0 : index
    %c0_0 = arith.constant 0 : index
    %0 = vector.load %arg1[%c0, %c0_0] : memref<24x128xf32, #tpu.memory_space<vmem>>, vector<24x128xf32>
    %1 = vector.shape_cast %0 : vector<24x128xf32> to vector<1x24x128xf32>
    %cst = arith.constant dense<0x7F800000> : vector<1xf32>
    %2 = vector.multi_reduction <minimumf>, %1, %cst [1, 2] : vector<1x24x128xf32> to vector<1xf32>
    %3 = vector.shape_cast %2 : vector<1xf32> to vector<1x1x1xf32>
    %4 = vector.extract %3[0, 0, 0] : f32 from vector<1x1x1xf32>
    %5 = vector.broadcast %4 : f32 to vector<24x128xf32>
    %6 = arith.subf %5, %0 : vector<24x128xf32>
    %cst_1 = arith.constant 1.000000e+00 : f32
    %7 = vector.broadcast %cst_1 : f32 to vector<24x128xf32>
    %8 = arith.mulf %6, %7 : vector<24x128xf32>
    %9 = math.exp %8 : vector<24x128xf32>
    %10 = arith.mulf %9, %0 : vector<24x128xf32>
    %c1_i32 = arith.constant 1 : i32
    %11 = tpu.dynamic_rotate %9 by %c1_i32 dim 1 : vector<24x128xf32>, i32 -> vector<24x128xf32>
    %c127_i32 = arith.constant 127 : i32
    %12 = tpu.dynamic_rotate %9 by %c127_i32 dim 1 : vector<24x128xf32>, i32 -> vector<24x128xf32>
    %13 = arith.addf %9, %11 : vector<24x128xf32>
    %14 = arith.addf %13, %12 : vector<24x128xf32>
    %c1_i32_2 = arith.constant 1 : i32
    %15 = tpu.dynamic_rotate %14 by %c1_i32_2 dim 0 : vector<24x128xf32>, i32 -> vector<24x128xf32>
    %c23_i32 = arith.constant 23 : i32
    %16 = tpu.dynamic_rotate %14 by %c23_i32 dim 0 : vector<24x128xf32>, i32 -> vector<24x128xf32>
    %17 = arith.addf %14, %15 : vector<24x128xf32>
    %18 = arith.addf %17, %16 : vector<24x128xf32>
    %c1_i32_3 = arith.constant 1 : i32
    %19 = tpu.dynamic_rotate %10 by %c1_i32_3 dim 1 : vector<24x128xf32>, i32 -> vector<24x128xf32>
    %c127_i32_4 = arith.constant 127 : i32
    %20 = tpu.dynamic_rotate %10 by %c127_i32_4 dim 1 : vector<24x128xf32>, i32 -> vector<24x128xf32>
    %21 = arith.addf %10, %19 : vector<24x128xf32>
    %22 = arith.addf %21, %20 : vector<24x128xf32>
    %c1_i32_5 = arith.constant 1 : i32
    %23 = tpu.dynamic_rotate %22 by %c1_i32_5 dim 0 : vector<24x128xf32>, i32 -> vector<24x128xf32>
    %c23_i32_6 = arith.constant 23 : i32
    %24 = tpu.dynamic_rotate %22 by %c23_i32_6 dim 0 : vector<24x128xf32>, i32 -> vector<24x128xf32>
    %25 = arith.addf %22, %23 : vector<24x128xf32>
    %26 = arith.addf %25, %24 : vector<24x128xf32>
    %27 = tpu.reciprocal %18 {approx = true} : vector<24x128xf32> -> vector<24x128xf32>
    %28 = arith.mulf %18, %27 : vector<24x128xf32>
    %cst_7 = arith.constant 2.000000e+00 : f32
    %29 = vector.broadcast %cst_7 : f32 to vector<24x128xf32>
    %30 = arith.subf %29, %28 : vector<24x128xf32>
    %31 = arith.mulf %27, %30 : vector<24x128xf32>
    %32 = arith.mulf %26, %31 : vector<24x128xf32>
    %c0_8 = arith.constant 0 : index
    %c0_9 = arith.constant 0 : index
    %33 = vector.load %arg2[%c0_8, %c0_9] : memref<24x128xf32, #tpu.memory_space<vmem>>, vector<24x128xf32>
    tpu.vector_store %arg2[%c0_8, %c0_9], %32 {strides = array<i32>} : memref<24x128xf32, #tpu.memory_space<vmem>>, vector<24x128xf32>,
    return
  }
  func.func @transform_0(%arg0: i32) -> (i32, i32) {
    %c0_i32 = arith.constant 0 : i32
    %c0_i32_0 = arith.constant 0 : i32
    return %arg0, %c0_i32 : i32, i32
  }
  func.func @transform_1(%arg0: i32) -> (i32, i32) {
    %c0_i32 = arith.constant 0 : i32
    %c0_i32_0 = arith.constant 0 : i32
    return %arg0, %c0_i32 : i32, i32
  }
}

</mosaic_0001>

<bundles_post_ra>
// kernel: tpu_custom_call.1
= control target key start
LH: loop header
LB: loop body
LE: loop exit
PB: predicated region body
PF: predicated region fallthrough
CT: control target
= control target key end

     0   :  { %6 = vsyncpa [#allocation3], 0  ;;  %s715_s0 = inlined_call_operand.hbm [shape: f32[48,128], index: 0, kind: input, shape index: {}]   ;;  %s716_s1 = inlined_call_operand.hbm [shape: f32[48,128], index: 1, kind: output, shape index: {}]  }
   0x1   :  { %8 = vsyncpa [#allocation3 + $0x1], 0 }
   0x2   :  { %9 = vsyncpa [#allocation4], 0 }
   0x3   :  { %11 = vsyncpa [#allocation4 + $0x1], 0  ;;  %s535_s6 = smov 0   ;;  %s537_s7 = smov 0  }
   0x4   :  { %s539_s8 = smov 0   ;;  %s541_s9 = smov 0  }
   0x5 LB: > { %s556_s10 = sadd.s32 4294967295, %s515_s9   ;;  %s345_s11 = sadd.s32 4294967294, %s515_s9   ;;  %s515_s9 = sphi %s541_s9, %s730_s9   ;;  %s511_s8 = sphi %s539_s8, %s729_s8   ;;  %s507_s7 = sphi %s537_s7, %s728_s7   ;;  %s503_s6 = sphi %s535_s6, %s727_s6  }
   0x6   : > { %s560_s12 = sadd.s32 1, %s515_s9   ;;  %s24_s13 = sadd.s32 1, %s511_s8 }
   0x7   : > { %s21_s14 = ssub.s32 %s515_s9, %s560_s12  ;;  %p31_p0 = scmp.ne.s32.totalorder %s511_s8, %s507_s7 }
   0x8   : > { %p22_p1 = scmp.eq.s32.totalorder %s21_s14, 0  ;;  %p32_p2 = scmp.eq.s32.totalorder %s515_s9, 0 }
   0x9   : > { %p37_p3 = scmp.ne.s32.totalorder %s507_s7, %s503_s6  ;;  %p38_p4 = scmp.eq.s32.totalorder %s556_s10, 0 }
   0xa   : > { %s572_s15 = scalar_select %p22_p1, %s511_s8, %s24_s13  }
   0xb   : > { %p33_p5 = por %p32_p2, %p31_p0  ;;  %p574_p6 = por %p38_p4, %p37_p3 }
   0xc   : > { %p61_p7 = scmp.eq.s32.totalorder %s556_s10, 1  ;;  %p67_p8 = scmp.eq.s32.totalorder %s345_s11, 1 }
   0xd   : > { %s719_s16 = scalar_select %p574_p6, 1, 0 }
   0xe   : > { %p371_p10 = scmp.lt.s32.totalorder %s515_s9, 2  ;;  %p581_p11 = por %p61_p7, %p31_p0 }
   0xf   : > { %p585_p12 = por %p67_p8, %p37_p3  ;;  %s87_s19 = sand.u32 1, %s511_s8  }
  0x10   : > { %s720_s17 = scalar_select %p581_p11, 1, 0 }
  0x11   : > { %s721_s18 = scalar_select %p585_p12, 1, 0 }
  0x12   : > { %s353_s20 = smul.u32 384, %s515_s9  ;;  %p596_p13 = pnand %p371_p10, %p33_p5 }
  0x13   : > { %s355_s21 = smul.u32 24, %s87_s19  ;;  %s602_s28 = scalar_lea.sflag [#allocation3], %s87_s19 }
  0x14   : > { %s594_s24 = scalar_lea.hbm %s715_s0, %s353_s20  ;;  %p425_p1 = pneg %p596_p13 }
  0x15   : > { %s91_s26 = scalar_lea.vmem [#allocation2], %s355_s21  ;;  %s423_s29 = scalar_lea.hbm %s594_s24, 384 }
  0x16   : > { %s98_s27 = sshll.u32 %s91_s26, 4  ;;  %p424_p0 = scmp.ne.s32.totalorder %s594_s24, %s423_s29  ;;  %s600_s27 = int_to_ptr.vmem [resolvable:$true] %s98_s27 }
  0x17   : > { %s428_s3 = scalar_lea.hbm %s715_s0, 768  ;;  %p429_p4 = scmp.lt.s32.totalorder %s594_s24, %s715_s0 }
  0x18   : > { %p426_p2 = pnand %p425_p1, %p424_p0  ;;  %p430_p5 = scmp.lt.s32.totalorder %s428_s3, %s423_s29 }
  0x1a   : > { %p427_p3 = pneg %p426_p2  ;;  %p431_p7 = por %p430_p5, %p429_p4 }
  0x1c   : > { %p432_p8 = pnand %p431_p7, %p427_p3 }
  0x1e   : > { %435 = shalt.err (!%p432_p8)
}
  0x1f   : > { %s436_s11 = scalar_lea.vmem %s600_s27, 384  ;;  %s517_s13 = smov [#allocation2]  }
  0x20   : > { %p437_p10 = scmp.ne.s32.totalorder %s600_s27, %s436_s11  ;;  %s441_s14 = sshll.u32 %s517_s13, 4  ;;  %s442_s14 = int_to_ptr.vmem [resolvable:$false] %s441_s14 }
  0x21   : > { %s443_s19 = scalar_lea.vmem %s442_s14, 768  ;;  %p444_p2 = scmp.lt.s32.totalorder %s600_s27, %s442_s14 }
  0x22   : > { %p439_p9 = pnand %p437_p10, %p425_p1  ;;  %p445_p12 = scmp.lt.s32.totalorder %s443_s19, %s436_s11 }
  0x24   : > { %p440_p0 = pneg %p439_p9  ;;  %p446_p11 = por %p445_p12, %p444_p2 }
  0x26   : > { %p447_p6 = pnand %p446_p11, %p440_p0 }
  0x28   : > { %450 = shalt.err (!%p447_p6)
}
  0x29   : > { %s518_s20 = smov 128   ;;  %s519_s21 = smov 8  }
  0x2a   : > { %366 = dma.hbm_to_vmem [thread:$0]  (!%p596_p13), %s594_s24, 384, %s600_s27, %s602_s28, %s518_s20, %s518_s20, %s519_s21  }
  0x2b   : > { %p349_p9 = scmp.ge.s32.totalorder %s515_s9, 1  ;;  %p106_p1 = scmp.lt.s32.totalorder %s515_s9, 3 }
  0x2d   : > { %p107_p3 = pnand %p349_p9, %p106_p1 }
  0x2e   : > { %s626_s22 = sand.u32 (!%p107_p3), 1, %s507_s7   ;;  %p723_p6 = scmp.ne.s32.totalorder (!%p107_p3), %s719_s16, 0 }
  0x2f   : > { %110 = sbr.rel (%p107_p3) target bundleno = 455 (0x1c7), region = 24  ;;  %s113_s26 = scalar_lea.sflag (!%p107_p3), [#allocation3], %s626_s22 }
  0x30   : > { %s356_s23 = smul.u32 (!%p107_p3), 24, %s626_s22 }
  0x32   : > { %s116_s29 = scalar_lea.vmem (!%p107_p3), [#allocation2], %s356_s23 }
  0x34   : > { %494 = dma.done.wait (%p723_p6), %s113_s26, 384  }
  0x35   : > { %496 = vsyncadd (%p723_p6), %s113_s26, 4294966912  ;;  %v137_v0 = vld [vmem:[%s116_s29] sm:$0xff]  ;;  %v138_v1 = vld [vmem:[%s116_s29 + $0x8] sm:$0xff]  ;;  %s520_s16 = smov 1   ;;  %s521_s25 = smov 127   ;;  %v185_v28 = vlaneseq }
  0x36   : > { %v139_v2 = vld [vmem:[%s116_s29 + $0x10] sm:$0xff]  ;;  %v140_v3 = vmin.f32 %v137_v0, %v138_v1  ;;  %s354_s27 = smul.u32 384, %s556_s10  ;;  %s134_s28 = scalar_lea.vmem [#allocation5], %s356_s23 }
  0x37   : > { %v636_v31 = vshrl.u32 %v185_v28, 7  ;;  %s272_s30 = sshll.u32 %s134_s28, 4  ;;  %s259_s4 = scalar_lea.sflag [#allocation4], %s626_s22  ;;  %s672_s30 = int_to_ptr.vmem [resolvable:$true] %s272_s30 }
  0x38   : > { %v141_v4 = vmin.f32 %v140_v3, %v139_v2  ;;  %s670_s3 = scalar_lea.hbm %s716_s1, %s354_s27  ;;  %s451_s5 = scalar_lea.vmem %s672_s30, 384 }
  0x39   : > { %vm187_vm0 = vcmp.lt.s32.totalorder %v636_v31, 1  ;;  %vm194_vm1 = vcmp.lt.s32.totalorder %v636_v31, 7  ;;  %p452_p11 = scmp.ne.s32.totalorder %s672_s30, %s451_s5  ;;  %p724_p12 = scmp.ne.s32.totalorder %s720_s17, 0 }
  0x3a   : > { %142 = vmin.xlane.f32.xlu0 %v141_v4  ;;  %s522_s11 = smov [#allocation5]  }
  0x3b   : > { %p453_p13 = pnand %p452_p11, %p724_p12  ;;  %s455_s13 = sshll.u32 %s522_s11, 4  ;;  %s456_s13 = int_to_ptr.vmem [resolvable:$false] %s455_s13 }
  0x3c   : > { %s457_s14 = scalar_lea.vmem %s456_s13, 768  ;;  %p458_p5 = scmp.lt.s32.totalorder %s672_s30, %s456_s13 }
  0x3d   : > { %p454_p4 = pneg %p453_p13  ;;  %p459_p7 = scmp.lt.s32.totalorder %s457_s14, %s451_s5 }
  0x3f   : > { %p460_p8 = por %p459_p7, %p458_p5 }
  0x41   : > { %p461_p10 = pnand %p460_p8, %p454_p4 }
  0xc3   : > { %v143_v5 = vpop.xlane.xlu0 %142 }
  0xc4   : > { %v144_v6 = vrot.slane %v143_v5, 4 }
  0xc6   : > { %v145_v7 = vmin.f32 %v143_v5, %v144_v6 }
  0xc8   : > { %v146_v8 = vrot.slane %v145_v7, 2 }
  0xca   : > { %v147_v9 = vmin.f32 %v145_v7, %v146_v8 }
  0xcc   : > { %v148_v10 = vrot.slane %v147_v9, 1 }
  0xce   : > { %v149_v11 = vmin.f32 %v147_v9, %v148_v10 }
  0xd0   : > { %357 = vpush %v149_v11 }
 0x101   : > { %s358_s24 = spop %357 }
 0x102   : > { %v151_v12 = vstv %s358_s24 }
 0x103   : > { %v152_v13 = vsub.f32 %v151_v12, %v137_v0  ;;  %v153_v14 = vsub.f32 %v151_v12, %v138_v1  ;;  %v154_v15 = vsub.f32 %v151_v12, %v139_v2 }
 0x105   : > { %v155_v16 = vmul.f32 1.442695, %v152_v13  ;;  %v157_v17 = vmul.f32 1.442695, %v153_v14  ;;  %v159_v18 = vmul.f32 1.442695, %v154_v15 }
 0x107   : > { %411 = vpow2.f32 %v155_v16 }
 0x108   : > { %413 = vpow2.f32 %v157_v17 }
 0x109   : > { %415 = vpow2.f32 %v159_v18 }
 0x114   : > { %v412_v19 = vpop.eup %411 }
 0x115   : > { %v414_v20 = vpop.eup %413  ;;  %164 = vrot.lane.b32.xlu0 %v412_v19, %s520_s16  ;;  %v161_v24 = vmul.f32 %v412_v19, %v137_v0 }
 0x116   : > { %v416_v21 = vpop.eup %415  ;;  %166 = vrot.lane.b32.xlu1 %v414_v20, %s520_s16  ;;  %v162_v23 = vmul.f32 %v414_v20, %v138_v1 }
 0x117   : > { %v163_v22 = vmul.f32 %v416_v21, %v139_v2 }
 0x119   : > { %208 = vrot.lane.b32.xlu0 %v163_v22, %s520_s16 }
 0x11a   : > { %168 = vrot.lane.b32.xlu1 %v416_v21, %s520_s16 }
 0x11d   : > { %212 = vrot.lane.b32.xlu0 %v162_v23, %s521_s25 }
 0x11e   : > { %170 = vrot.lane.b32.xlu1 %v412_v19, %s521_s25 }
 0x122   : > { %172 = vrot.lane.b32.xlu1 %v414_v20, %s521_s25 }
 0x126   : > { %174 = vrot.lane.b32.xlu1 %v416_v21, %s521_s25 }
 0x12a   : > { %204 = vrot.lane.b32.xlu1 %v161_v24, %s520_s16 }
 0x12e   : > { %206 = vrot.lane.b32.xlu1 %v162_v23, %s520_s16 }
 0x132   : > { %210 = vrot.lane.b32.xlu1 %v161_v24, %s521_s25 }
 0x136   : > { %214 = vrot.lane.b32.xlu1 %v163_v22, %s521_s25 }
 0x187   : > { %v165_v27 = vpop.permute.xlu0 %164 }
 0x188   : > { %v167_v25 = vpop.permute.xlu1 %166  ;;  %v176_v30 = vadd.f32 %v412_v19, %v165_v27 }
 0x189   : > { %v177_v32 = vadd.f32 %v414_v20, %v167_v25 }
 0x18b   : > { %v209_v56 = vpop.permute.xlu0 %208 }
 0x18c   : > { %v169_v26 = vpop.permute.xlu1 %168  ;;  %v218_v1 = vadd.f32 %v209_v56, %v163_v22 }
 0x18d   : > { %v178_v36 = vadd.f32 %v416_v21, %v169_v26 }
 0x18f   : > { %v213_v0 = vpop.permute.xlu0 %212 }
 0x190   : > { %v171_v29 = vpop.permute.xlu1 %170 }
 0x191   : > { %v179_v33 = vadd.f32 %v176_v30, %v171_v29 }
 0x193   : > { %v182_v37 = vrot.slane %v179_v33, 7  ;;  %v191_v47 = vrot.slane %v179_v33, 1 }
 0x194   : > { %v173_v34 = vpop.permute.xlu1 %172 }
 0x195   : > { %v180_v35 = vadd.f32 %v177_v32, %v173_v34 }
 0x197   : > { %v183_v38 = vrot.slane %v180_v35, 7  ;;  %v192_v42 = vrot.slane %v180_v35, 1 }
 0x198   : > { %v175_v39 = vpop.permute.xlu1 %174 }
 0x199   : > { %v189_v40 = vsel %vm187_vm0, %v182_v37, %v183_v38  ;;  %v181_v41 = vadd.f32 %v178_v36, %v175_v39  ;;  %v196_v54 = vsel %vm194_vm1, %v191_v47, %v192_v42 }
 0x19a   : > { %v199_v45 = vadd.f32 %v189_v40, %v180_v35 }
 0x19b   : > { %v184_v43 = vrot.slane %v181_v41, 7  ;;  %v193_v44 = vrot.slane %v181_v41, 1 }
 0x19c   : > { %v205_v46 = vpop.permute.xlu1 %204 }
 0x19d   : > { %v188_v48 = vsel %vm187_vm0, %v183_v38, %v184_v43  ;;  %v190_v49 = vsel %vm187_vm0, %v184_v43, %v182_v37  ;;  %v195_v50 = vsel %vm194_vm1, %v192_v42, %v193_v44  ;;  %v197_v55 = vsel %vm194_vm1, %v193_v44, %v191_v47 }
 0x19e   : > { %v198_v51 = vadd.f32 %v190_v49, %v179_v33  ;;  %v200_v52 = vadd.f32 %v188_v48, %v181_v41  ;;  %v202_v53 = vadd.f32 %v199_v45, %v195_v50  ;;  %v216_v60 = vadd.f32 %v205_v46, %v161_v24 }
 0x1a0   : > { %v201_v57 = vadd.f32 %v198_v51, %v196_v54  ;;  %v203_v58 = vadd.f32 %v200_v52, %v197_v55  ;;  %417 = vrcp.f32 %v202_v53  ;;  %v207_v59 = vpop.permute.xlu1 %206 }
 0x1a1   : > { %v217_v61 = vadd.f32 %v207_v59, %v162_v23 }
 0x1a2   : > { %419 = vrcp.f32 %v201_v57 }
 0x1a3   : > { %421 = vrcp.f32 %v203_v58  ;;  %v220_v2 = vadd.f32 %v217_v61, %v213_v0 }
 0x1a4   : > { %v211_v62 = vpop.permute.xlu1 %210 }
 0x1a5   : > { %v219_v63 = vadd.f32 %v216_v60, %v211_v62  ;;  %v223_v6 = vrot.slane %v220_v2, 7  ;;  %v229_v10 = vrot.slane %v220_v2, 1 }
 0x1a7   : > { %v222_v4 = vrot.slane %v219_v63, 7  ;;  %v228_v16 = vrot.slane %v219_v63, 1 }
 0x1a8   : > { %v215_v3 = vpop.permute.xlu1 %214 }
 0x1a9   : > { %v221_v5 = vadd.f32 %v218_v1, %v215_v3  ;;  %v226_v11 = vsel %vm187_vm0, %v222_v4, %v223_v6  ;;  %v232_v29 = vsel %vm194_vm1, %v228_v16, %v229_v10 }
 0x1aa   : > { %v235_v21 = vadd.f32 %v226_v11, %v220_v2 }
 0x1ab   : > { %v224_v7 = vrot.slane %v221_v5, 7  ;;  %v230_v8 = vrot.slane %v221_v5, 1 }
 0x1ad   : > { %v418_v9 = vpop.eup %417  ;;  %v227_v12 = vsel %vm187_vm0, %v224_v7, %v222_v4  ;;  %v225_v14 = vsel %vm187_vm0, %v223_v6, %v224_v7  ;;  %v231_v17 = vsel %vm194_vm1, %v229_v10, %v230_v8  ;;  %v233_v32 = vsel %vm194_vm1, %v230_v8, %v228_v16 }
 0x1ae   : > { %v244_v13 = vmul.f32 %v418_v9, %v202_v53  ;;  %v234_v22 = vadd.f32 %v227_v12, %v219_v63  ;;  %v236_v24 = vadd.f32 %v225_v14, %v221_v5  ;;  %v238_v27 = vadd.f32 %v235_v21, %v231_v17 }
 0x1af   : > { %v420_v15 = vpop.eup %419 }
 0x1b0   : > { %v422_v18 = vpop.eup %421  ;;  %v243_v19 = vmul.f32 %v420_v15, %v201_v57  ;;  %v247_v20 = vsub.f32 2.0, %v244_v13  ;;  %v237_v33 = vadd.f32 %v234_v22, %v232_v29  ;;  %v239_v36 = vadd.f32 %v236_v24, %v233_v32 }
 0x1b1   : > { %v245_v23 = vmul.f32 %v422_v18, %v203_v58 }
 0x1b2   : > { %v246_v25 = vsub.f32 2.0, %v243_v19  ;;  %v250_v26 = vmul.f32 %v418_v9, %v247_v20 }
 0x1b3   : > { %v248_v28 = vsub.f32 2.0, %v245_v23 }
 0x1b4   : > { %v249_v30 = vmul.f32 %v420_v15, %v246_v25  ;;  %v253_v34 = vmul.f32 %v250_v26, %v238_v27 }
 0x1b5   : > { %v251_v35 = vmul.f32 %v422_v18, %v248_v28 }
 0x1b6   : > { %v252_v37 = vmul.f32 %v249_v30, %v237_v33  ;;  %256 = vst [vmem:[%s134_s28 + $0x8] sm:$0xff] %v253_v34 }
 0x1b7   : > { %v254_v38 = vmul.f32 %v251_v35, %v239_v36 }
 0x1b8   : > { %255 = vst [vmem:[%s134_s28] sm:$0xff] %v252_v37 }
 0x1b9   : > { %257 = vst [vmem:[%s134_s28 + $0x10] sm:$0xff] %v254_v38 }
 0x1ba   : > { %464 = shalt.err (!%p461_p10)
}
 0x1bb   : > { %s465_s19 = scalar_lea.hbm %s670_s3, 384  ;;  %s469_s23 = scalar_lea.hbm %s716_s1, 768 }
 0x1bc   : > { %p466_p0 = scmp.ne.s32.totalorder %s670_s3, %s465_s19  ;;  %p470_p1 = scmp.lt.s32.totalorder %s670_s3, %s716_s1 }
 0x1bd   : > { %p471_p3 = scmp.lt.s32.totalorder %s469_s23, %s465_s19 }
 0x1be   : > { %p467_p2 = pnand %p466_p0, %p724_p12 }
 0x1bf   : > { %p472_p6 = por %p471_p3, %p470_p1 }
 0x1c0   : > { %p468_p9 = pneg %p467_p2 }
 0x1c2   : > { %p473_p11 = pnand %p472_p6, %p468_p9 }
 0x1c4   : > { %476 = shalt.err (!%p473_p11)
}
 0x1c5   : > { %s523_s24 = smov 128   ;;  %s524_s16 = smov 8  }
 0x1c6   : > { %361 = dma.vmem_to_hbm [thread:$0]  (%p724_p12), %s672_s30, 384, %s670_s3, %s259_s4, %s523_s24, %s523_s24, %s524_s16  }
 0x1c7 PF: > { %s287_s25 = sand.u32 1, %s503_s6   ;;  %p725_p13 = scmp.ne.s32.totalorder %s721_s18, 0 }
 0x1c8   : > { %p726_p4 = scmp.ge.s32.totalorder %s515_s9, 2  ;;  %s288_s27 = scalar_lea.sflag [#allocation4], %s287_s25 }
 0x1ca   : > { %p368_p5 = pnand %p726_p4, %p725_p13 }
 0x1cc   : > { %p369_p7 = pneg %p368_p5 }
 0x1ce   : > { %498 = dma.done.wait (%p369_p7), %s288_s27, 384  }
 0x1cf   : > { %500 = vsyncadd (%p369_p7), %s288_s27, 4294966912  ;;  %p14_p8 = scmp.ge.s32.totalorder %s560_s12, 4   ;;  %s727_s6 = smov %s507_s7 }
 0x1d0   : > { %s728_s7 = smov %s511_s8  ;;  %s729_s8 = smov %s572_s15 }
 0x1d1   : > { %s730_s9 = smov %s560_s12  ;;  %16 = sbr.rel (!%p14_p8) target bundleno = 5 (0x5), region = 69 }
 0x1d6   :  { %293 = vsyncpa [#allocation3], 1 }
 0x1d7   :  { %295 = vsyncpa [#allocation3 + $0x1], 1 }
 0x1d8   :  { %296 = vsyncpa [#allocation4], 1 }
 0x1d9   :  { %298 = vsyncpa [#allocation4 + $0x1], 1 }

</bundles_post_ra>
